<compile_context>
chip_gen: v5e
topology: v5e:2x2
jax: 0.10.0
libtpu: 0.0.40
codegen_flags: <defaults>
</compile_context>

<pallas_src>
import functools

import jax
import jax.numpy as jnp
from jax import lax
from jax.experimental import pallas as pl
from jax.experimental.pallas import tpu as pltpu

_LANE = 128
_UNROLL_LIMIT = 8  # statically unroll the hidden-layer loop up to this depth


def _round_up(x, m):
    return ((x + m - 1) // m) * m


def _tpu_topology():
    """(per-core VMEM bytes, #TensorCores sharing the grid)."""
    vmem_cap = 64 << 20  # conservative default (v7x-sized)
    try:
        vmem_cap = int(pltpu.get_tpu_info().vmem_capacity_bytes)
    except Exception:
        pass
    num_tc = 1
    try:
        kind = jax.devices()[0].device_kind.lower()
        if "v7" in kind:           # v7x: 2 TensorCores per chip
            num_tc = 2
    except Exception:
        pass
    return vmem_cap, num_tc


# ----------------------------- Pallas kernel -------------------------------

def _act(h, acti):
    # activations stay in f32 (v5e has no bf16 VPU/EUP path)
    if acti == "relu":
        return jnp.maximum(h, 0.0)
    if acti == "leakyrelu":
        return jnp.where(h >= 0.0, h, 0.01 * h)
    if acti == "softplus":
        return jax.nn.softplus(h)
    raise ValueError(f"unknown activation: {acti}")


def _mm(a, w):
    """MXU matmul; match operand dtypes (weights may be bf16), accumulate f32."""
    if a.dtype != w.dtype:
        a = a.astype(w.dtype)
    return jnp.dot(a, w, preferred_element_type=jnp.float32)


def _mlp_kernel(x_ref, w0_ref, b0_ref, *rest, num_layer, acti, stream):
    """Fused MLP over one batch tile.

    x_ref : (tm, input_dim)            -- input_dim NOT padded
    w0_ref: (input_dim, rep_dim_p)
    b0_ref: (1, rep_dim_p)             -- f32
    resident: wh_ref (L, rep_dim_p, rep_dim_p), bh_ref (L, rep_dim_p)
    stream  : wh_hbm (L, rep_dim_p, rep_dim_p) in HBM, bh_ref (L, rep_dim_p),
              scratch wbuf (2, rep_dim_p, rep_dim_p), wsem DMA((2,))
    o_ref : (tm, rep_dim_p)            -- lane-dense unmasked store
    """
    if num_layer == 0:
        (o_ref,) = rest
        h = _mm(x_ref[...], w0_ref[...]) + b0_ref[...]
        o_ref[...] = h.astype(o_ref.dtype)
        return

    if not stream:
        wh_ref, bh_ref, o_ref = rest

        h = _mm(x_ref[...], w0_ref[...]) + b0_ref[...]
        if num_layer <= _UNROLL_LIMIT:
            for i in range(num_layer):
                h = _mm(_act(h, acti), wh_ref[i]) + bh_ref[pl.ds(i, 1), :]
        else:
            def body(i, h):
                return _mm(_act(h, acti), wh_ref[i]) + bh_ref[pl.ds(i, 1), :]
            # unroll=2: let the LLO scheduler overlap layer i's activation
            # (VPU/EUP) with layer i+1's weight loads / MXU pushes.
            h = lax.fori_loop(0, num_layer, body, h, unroll=2)
        o_ref[...] = h.astype(o_ref.dtype)
        return

    # --- streaming path: per-layer weight DMA, double-buffered ---------------
    wh_hbm, bh_ref, o_ref, wbuf, wsem = rest

    def start_fetch(layer, slot):
        pltpu.make_async_copy(wh_hbm.at[layer], wbuf.at[slot],
                              wsem.at[slot]).start()

    def wait_fetch(slot):
        pltpu.make_async_copy(wh_hbm.at[0], wbuf.at[slot],
                              wsem.at[slot]).wait()

    # Prime layer 0 so the DMA overlaps the first (input) matmul.
    start_fetch(0, 0)
    h = _mm(x_ref[...], w0_ref[...]) + b0_ref[...]

    def body(i, h):
        slot = lax.rem(i, 2)
        wait_fetch(slot)

        @pl.when(i + 1 < num_layer)
        def _():
            start_fetch(i + 1, 1 - slot)

        return _mm(_act(h, acti), wbuf[slot]) + bh_ref[pl.ds(i, 1), :]

    h = lax.fori_loop(0, num_layer, body, h)
    o_ref[...] = h.astype(o_ref.dtype)


# ------------------------ one-time parameter preparation --------------------

def prepare_encoder_params(w0, b0, wh=None, bh=None, *, compute_dtype=None):
    """Pad rep_dim to a lane multiple and (optionally) cast weights to bf16,
    ONCE, in HBM.  Reuse the returned dict across forward calls.

    w0: (input_dim, rep_dim) stored as (in, out); b0: (rep_dim,) or (1, rep_dim)
    wh: (num_layer, rep_dim, rep_dim) or None
    bh: (num_layer, rep_dim) / (num_layer, 1, rep_dim) or None
    compute_dtype: e.g. jnp.bfloat16 -> halves weight DMA bytes + VMEM and uses
       the bf16-native MXU path on all generations.  None keeps full f32.
    Padding is numerically exact: padded weight ROWS and padded bias/weight
    COLUMNS are zero, so padded lanes never leak into valid outputs.
    """
    input_dim, rep_dim = w0.shape
    num_layer = 0 if (wh is None or wh.shape[0] == 0) else int(wh.shape[0])
    rep_dim_p = _round_up(rep_dim, _LANE)
    w_dtype = jnp.dtype(compute_dtype) if compute_dtype is not None else jnp.dtype(w0.dtype)

    w0p = jnp.zeros((input_dim, rep_dim_p), w_dtype)
    w0p = w0p.at[:, :rep_dim].set(w0.astype(w_dtype))
    b0p = jnp.zeros((1, rep_dim_p), jnp.float32)
    b0p = b0p.at[:, :rep_dim].set(jnp.reshape(b0, (1, rep_dim)).astype(jnp.float32))

    params = {
        "w0": w0p, "b0": b0p, "wh": None, "bh": None,
        "input_dim": input_dim, "rep_dim": rep_dim, "rep_dim_p": rep_dim_p,
        "num_layer": num_layer, "w_dtype": w_dtype,
    }
    if num_layer > 0:
        whp = jnp.zeros((num_layer, rep_dim_p, rep_dim_p), w_dtype)
        whp = whp.at[:, :rep_dim, :rep_dim].set(wh.astype(w_dtype))
        bhp = jnp.zeros((num_layer, rep_dim_p), jnp.float32)
        bhp = bhp.at[:, :rep_dim].set(
            jnp.reshape(bh, (num_layer, rep_dim)).astype(jnp.float32))
        params["wh"] = whp
        params["bh"] = bhp
    return params


# ------------------------------- forward ------------------------------------

def encoder_net_forward(x, params, *, acti="relu", tm=None, stream_weights=None):
    """Apply encoder_net to x of shape (batch, input_dim) using prepared params."""
    batch, input_dim = x.shape
    if input_dim != params["input_dim"]:
        raise ValueError("x feature dim does not match prepared params")
    rep_dim = params["rep_dim"]
    rep_dim_p = params["rep_dim_p"]
    num_layer = params["num_layer"]
    w_dtype = params["w_dtype"]
    out_dtype = x.dtype

    # cast x once in HBM so the first matmul operands already match (bf16 path)
    x_in = x.astype(w_dtype) if x.dtype != w_dtype else x

    vmem_cap, num_tc = _tpu_topology()
    budget = max(int(vmem_cap * 0.80), 32 << 20)   # ~102 MiB on v5e/v6e, ~51 MiB on v7x

    x_item = jnp.dtype(w_dtype).itemsize
    out_item = jnp.dtype(out_dtype).itemsize
    w_item = jnp.dtype(w_dtype).itemsize
    bias_bytes = (1 + num_layer) * rep_dim_p * 4          # biases stay f32
    w0_bytes = input_dim * rep_dim_p * w_item
    hid_resident = num_layer * rep_dim_p * rep_dim_p * w_item
    hid_stream = 2 * rep_dim_p * rep_dim_p * w_item

    def footprint(tile, stream):
        act = 2 * tile * input_dim * x_item + 2 * tile * rep_dim_p * out_item
        live_h = tile * rep_dim_p * 4
        hid = (hid_stream if stream else hid_resident) if num_layer > 0 else 0
        return act + live_h + w0_bytes + bias_bytes + hid + (2 << 20)

    # ---- batch tile: as large as VMEM allows; split only for v7x megacore ----
    b128 = _round_up(batch, _LANE)
    if tm is None:
        if num_tc >= 2 and b128 >= 2 * _LANE:
            # give each TensorCore >=128 rows; don't split tiny batches (that
            # would just double per-TC weight DMA for no compute gain)
            tm = min(1024, _round_up(b128 // 2, _LANE))
        else:
            tm = min(1024, b128)
    else:
        tm = max(8, _round_up(int(tm), 8))

    # ---- hidden-weight residency decision ------------------------------------
    if stream_weights is None:
        stream = num_layer > 0 and footprint(tm, False) > budget
    else:
        stream = bool(stream_weights) and num_layer > 0

    while footprint(tm, stream) > budget and tm > _LANE:
        tm = max(_LANE, _round_up(tm // 2, _LANE))

    batch_p = _round_up(batch, tm)
    if batch_p != batch or x_in is not x and False:
        pass  # (kept for clarity; padding handled just below)
    if batch_p != batch:
        xp = jnp.zeros((batch_p, input_dim), x_in.dtype).at[:batch].set(x_in)
    else:
        xp = x_in

    # ---- specs ---------------------------------------------------------------
    inputs = [xp, params["w0"], params["b0"]]
    in_specs = [
        pl.BlockSpec((tm, input_dim), lambda i: (i, 0)),
        # Constant-index parameter blocks: single-buffer them (Buffered(1)).
        pl.BlockSpec((input_dim, rep_dim_p), lambda i: (0, 0),
                     pipeline_mode=pl.Buffered(1)),
        pl.BlockSpec((1, rep_dim_p), lambda i: (0, 0),
                     pipeline_mode=pl.Buffered(1)),
    ]
    scratch_shapes = []
    if num_layer > 0:
        if stream:
            # leave the layer stack in HBM; kernel DMAs one layer at a time
            in_specs.append(pl.BlockSpec(memory_space=pl.ANY))
            scratch_shapes = [
                pltpu.VMEM((2, rep_dim_p, rep_dim_p), w_dtype),
                pltpu.SemaphoreType.DMA((2,)),
            ]
        else:
            in_specs.append(
                pl.BlockSpec((num_layer, rep_dim_p, rep_dim_p),
                             lambda i: (0, 0, 0), pipeline_mode=pl.Buffered(1)))
        in_specs.append(
            pl.BlockSpec((num_layer, rep_dim_p), lambda i: (0, 0),
                         pipeline_mode=pl.Buffered(1)))
        inputs += [params["wh"], params["bh"]]

    # ---- VMEM limit: sized from the real footprint, generation-aware cap -----
    need = footprint(tm, stream) + (2 << 20)
    vmem_limit = int(min(budget, max(need, 32 << 20)))

    kernel = functools.partial(_mlp_kernel, num_layer=num_layer, acti=acti,
                               stream=stream)

    out_p = pl.pallas_call(
        kernel,
        out_shape=jax.ShapeDtypeStruct((batch_p, rep_dim_p), out_dtype),
        grid_spec=pltpu.PrefetchScalarGridSpec(
            num_scalar_prefetch=0,
            grid=(batch_p // tm,),
            in_specs=in_specs,
            out_specs=pl.BlockSpec((tm, rep_dim_p), lambda i: (i, 0)),
            scratch_shapes=scratch_shapes,
        ),
        compiler_params=pltpu.CompilerParams(
            dimension_semantics=("parallel",),
            vmem_limit_bytes=vmem_limit),
    )(*inputs)

    # Crop padded batch rows and padded output lanes (no-op if unpadded).
    return out_p[:batch, :rep_dim]


def encoder_net_apply(x, w0, b0, wh=None, bh=None, *, acti="relu",
                      compute_dtype=None, tm=None, stream_weights=None):
    """Convenience one-shot wrapper (prepares params on every call)."""
    params = prepare_encoder_params(w0, b0, wh, bh, compute_dtype=compute_dtype)
    return encoder_net_forward(x, params, acti=acti, tm=tm,
                               stream_weights=stream_weights)


# ------------------------- deterministic parameter init ---------------------

def init_params(key, num_layer, input_dim, rep_dim, dtype=jnp.float32):
    """PyTorch-Linear-style uniform init, stored as (in, out) matrices."""
    keys = jax.random.split(key, 2 * (num_layer + 1))

    def lin_init(kw, kb, fan_in, fan_out):
        bound = 1.0 / (fan_in ** 0.5)
        w = jax.random.uniform(kw, (fan_in, fan_out), dtype, -bound, bound)
        b = jax.random.uniform(kb, (1, fan_out), dtype, -bound, bound)
        return w, b

    w0, b0 = lin_init(keys[0], keys[1], input_dim, rep_dim)
    whs, bhs = [], []
    for i in range(num_layer):
        w, b = lin_init(keys[2 + 2 * i], keys[3 + 2 * i], rep_dim, rep_dim)
        whs.append(w)
        bhs.append(b)
    if num_layer > 0:
        wh = jnp.stack(whs, axis=0)   # (L, rep, rep)
        bh = jnp.stack(bhs, axis=0)   # (L, 1, rep)
    else:
        wh, bh = None, None
    return w0, b0, wh, bh


# --------------------------- pure-JAX reference ------------------------------

def reference_forward(x, w0, b0, wh, bh, acti="relu"):
    def act(h):
        if acti == "relu":
            return jnp.maximum(h, 0.0)
        elif acti == "leakyrelu":
            return jnp.where(h >= 0.0, h, 0.01 * h)
        else:
            return jax.nn.softplus(h)

    h = x @ w0 + b0.reshape(1, -1)
    n = 0 if wh is None else wh.shape[0]
    for i in range(n):
        h = act(h)
        h = h @ wh[i] + bh[i].reshape(1, -1)
    return h


# --------------------------------- main --------------------------------------

if __name__ == "__main__":
    key = jax.random.PRNGKey(0)

    def run_case(num_layer, input_dim, rep_dim, batch, acti, subkey, *,
                 compute_dtype=None, tm=None, stream_weights=None,
                 atol=1e-4, rtol=1e-4):
        k_x, k_p = jax.random.split(subkey)
        x = jax.random.normal(k_x, (batch, input_dim), dtype=jnp.float32)
        w0, b0, wh, bh = init_params(k_p, num_layer, input_dim, rep_dim)
        params = prepare_encoder_params(w0, b0, wh, bh,
                                        compute_dtype=compute_dtype)
        out = encoder_net_forward(x, params, acti=acti, tm=tm,
                                  stream_weights=stream_weights)
        out = jax.block_until_ready(out)
        ref = reference_forward(x, w0, b0, wh, bh, acti=acti)
        assert out.shape == (batch, rep_dim), out.shape
        err = jnp.max(jnp.abs(out - ref))
        assert jnp.allclose(out, ref, atol=atol, rtol=rtol), (
            f"mismatch (L={num_layer}, acti={acti}, dt={compute_dtype}): "
            f"max|err|={err}")

    keys = jax.random.split(key, 5)
    # main case from the spec: statically unrolled, resident-weight path
    run_case(2, 16, 32, 16, "relu", keys[0])
    # num_layer == 0 (just one Linear) + batch not a tile multiple
    run_case(0, 16, 32, 37, "leakyrelu", keys[1])
    # deep net -> fori_loop(unroll=2) resident path, softplus, ragged batch
    run_case(10, 16, 32, 200, "softplus", keys[2])
    # forced per-layer weight streaming (manual double-buffered DMA), 2-step grid
    run_case(3, 16, 32, 200, "relu", keys[3], tm=128, stream_weights=True)
    # bf16 MXU operands (weights + x cast once in HBM); looser tolerance
    run_case(2, 24, 64, 64, "relu", keys[4], compute_dtype=jnp.bfloat16,
             atol=5e-2, rtol=5e-2)

    print("KERNEL_OK")
</pallas_src>

<mosaic_0001>
module attributes {stable_mosaic.version = 11 : i64} {
  func.func @_mlp_kernel(%arg0: i32, %arg1: memref<128x16xf32, #tpu.memory_space<vmem>>, %arg2: memref<16x128xf32, #tpu.memory_space<vmem>>, %arg3: memref<1x128xf32, #tpu.memory_space<vmem>>, %arg4: memref<2x128x128xf32, #tpu.memory_space<vmem>>, %arg5: memref<2x128xf32, #tpu.memory_space<vmem>>, %arg6: memref<128x128xf32, #tpu.memory_space<vmem>>) attributes {dimension_semantics = [#tpu.dimension_semantics<parallel>], iteration_bounds = array<i64: 1>, scalar_prefetch = 0 : i64, scratch_operands = 0 : i64, tpu.core_type = #tpu.core_type<tc>, window_params = [{transform_indices = @transform_0, window_bounds = array<i64: 128, 16>}, {pipeline_mode = #tpu.pipeline_mode<synchronous>, transform_indices = @transform_1, window_bounds = array<i64: 16, 128>}, {pipeline_mode = #tpu.pipeline_mode<synchronous>, transform_indices = @transform_2, window_bounds = array<i64: 1, 128>}, {pipeline_mode = #tpu.pipeline_mode<synchronous>, transform_indices = @transform_3, window_bounds = array<i64: 2, 128, 128>}, {pipeline_mode = #tpu.pipeline_mode<synchronous>, transform_indices = @transform_4, window_bounds = array<i64: 2, 128>}, {transform_indices = @transform_5, window_bounds = array<i64: 128, 128>}]} {
    %c0 = arith.constant 0 : index
    %c0_0 = arith.constant 0 : index
    %0 = vector.load %arg1[%c0, %c0_0] : memref<128x16xf32, #tpu.memory_space<vmem>>, vector<128x16xf32>
    %c0_1 = arith.constant 0 : index
    %c0_2 = arith.constant 0 : index
    %1 = vector.load %arg2[%c0_1, %c0_2] : memref<16x128xf32, #tpu.memory_space<vmem>>, vector<16x128xf32>
    %cst = arith.constant dense<0.000000e+00> : vector<128x128xf32>
    %2 = tpu.matmul %0, %1, %cst {dimension_numbers = #tpu.dot_dimension_numbers<[1], [0], [0], [1], [0, 0, 1, 1], [], []>} : vector<128x16xf32>, vector<16x128xf32>, vector<128x128xf32> -> vector<128x128xf32>
    %c0_3 = arith.constant 0 : index
    %c0_4 = arith.constant 0 : index
    %3 = vector.load %arg3[%c0_3, %c0_4] : memref<1x128xf32, #tpu.memory_space<vmem>>, vector<1x128xf32>
    %4 = vector.broadcast %3 : vector<1x128xf32> to vector<128x128xf32>
    %5 = arith.addf %2, %4 : vector<128x128xf32>
    %cst_5 = arith.constant 0.000000e+00 : f32
    %6 = vector.broadcast %cst_5 : f32 to vector<128x128xf32>
    %7 = arith.maximumf %5, %6 : vector<128x128xf32>
    %c0_6 = arith.constant 0 : index
    %c0_7 = arith.constant 0 : index
    %c0_8 = arith.constant 0 : index
    %8 = vector.load %arg4[%c0_6, %c0_7, %c0_8] : memref<2x128x128xf32, #tpu.memory_space<vmem>>, vector<1x128x128xf32>
    %9 = vector.shape_cast %8 : vector<1x128x128xf32> to vector<128x128xf32>
    %cst_9 = arith.constant dense<0.000000e+00> : vector<128x128xf32>
    %10 = tpu.matmul %7, %9, %cst_9 {dimension_numbers = #tpu.dot_dimension_numbers<[1], [0], [0], [1], [0, 0, 1, 1], [], []>} : vector<128x128xf32>, vector<128x128xf32>, vector<128x128xf32> -> vector<128x128xf32>
    %c0_10 = arith.constant 0 : index
    %c0_11 = arith.constant 0 : index
    %11 = vector.load %arg5[%c0_10, %c0_11] : memref<2x128xf32, #tpu.memory_space<vmem>>, vector<1x128xf32>
    %12 = vector.broadcast %11 : vector<1x128xf32> to vector<128x128xf32>
    %13 = arith.addf %10, %12 : vector<128x128xf32>
    %cst_12 = arith.constant 0.000000e+00 : f32
    %14 = vector.broadcast %cst_12 : f32 to vector<128x128xf32>
    %15 = arith.maximumf %13, %14 : vector<128x128xf32>
    %c1 = arith.constant 1 : index
    %c0_13 = arith.constant 0 : index
    %c0_14 = arith.constant 0 : index
    %16 = vector.load %arg4[%c1, %c0_13, %c0_14] : memref<2x128x128xf32, #tpu.memory_space<vmem>>, vector<1x128x128xf32>
    %17 = vector.shape_cast %16 : vector<1x128x128xf32> to vector<128x128xf32>
    %cst_15 = arith.constant dense<0.000000e+00> : vector<128x128xf32>
    %18 = tpu.matmul %15, %17, %cst_15 {dimension_numbers = #tpu.dot_dimension_numbers<[1], [0], [0], [1], [0, 0, 1, 1], [], []>} : vector<128x128xf32>, vector<128x128xf32>, vector<128x128xf32> -> vector<128x128xf32>
    %c1_16 = arith.constant 1 : index
    %c0_17 = arith.constant 0 : index
    %19 = vector.load %arg5[%c1_16, %c0_17] : memref<2x128xf32, #tpu.memory_space<vmem>>, vector<1x128xf32>
    %20 = vector.broadcast %19 : vector<1x128xf32> to vector<128x128xf32>
    %21 = arith.addf %18, %20 : vector<128x128xf32>
    %c0_18 = arith.constant 0 : index
    %c0_19 = arith.constant 0 : index
    %22 = vector.load %arg6[%c0_18, %c0_19] : memref<128x128xf32, #tpu.memory_space<vmem>>, vector<128x128xf32>
    tpu.vector_store %arg6[%c0_18, %c0_19], %21 {strides = array<i32>} : memref<128x128xf32, #tpu.memory_space<vmem>>, vector<128x128xf32>,
    return
  }
  func.func @transform_0(%arg0: i32) -> (i32, i32) {
    %c0_i32 = arith.constant 0 : i32
    %c0_i32_0 = arith.constant 0 : i32
    return %arg0, %c0_i32 : i32, i32
  }
  func.func @transform_1(%arg0: i32) -> (i32, i32) {
    %c0_i32 = arith.constant 0 : i32
    %c0_i32_0 = arith.constant 0 : i32
    %c0_i32_1 = arith.constant 0 : i32
    return %c0_i32, %c0_i32_0 : i32, i32
  }
  func.func @transform_2(%arg0: i32) -> (i32, i32) {
    %c0_i32 = arith.constant 0 : i32
    %c0_i32_0 = arith.constant 0 : i32
    %c0_i32_1 = arith.constant 0 : i32
    return %c0_i32, %c0_i32_0 : i32, i32
  }
  func.func @transform_3(%arg0: i32) -> (i32, i32, i32) {
    %c0_i32 = arith.constant 0 : i32
    %c0_i32_0 = arith.constant 0 : i32
    %c0_i32_1 = arith.constant 0 : i32
    %c0_i32_2 = arith.constant 0 : i32
    return %c0_i32, %c0_i32_0, %c0_i32_1 : i32, i32, i32
  }
  func.func @transform_4(%arg0: i32) -> (i32, i32) {
    %c0_i32 = arith.constant 0 : i32
    %c0_i32_0 = arith.constant 0 : i32
    %c0_i32_1 = arith.constant 0 : i32
    return %c0_i32, %c0_i32_0 : i32, i32
  }
  func.func @transform_5(%arg0: i32) -> (i32, i32) {
    %c0_i32 = arith.constant 0 : i32
    %c0_i32_0 = arith.constant 0 : i32
    return %arg0, %c0_i32 : i32, i32
  }
}

</mosaic_0001>

<bundles_post_ra>
// kernel: tpu_custom_call.1
= control target key start
LH: loop header
LB: loop body
LE: loop exit
PB: predicated region body
PF: predicated region fallthrough
CT: control target
= control target key end

     0   :  { %10 = vsyncpa [#allocation3], 0  ;;  %s657_s0 = inlined_call_operand.vmem [shape: f32[128,16], index: 0, kind: input, shape index: {}]   ;;  %s658_s1 = inlined_call_operand.vmem [shape: f32[16,128], index: 1, kind: input, shape index: {}]   ;;  %s659_s2 = inlined_call_operand.vmem [shape: f32[1,128], index: 2, kind: input, shape index: {}]   ;;  %s660_s3 = inlined_call_operand.hbm [shape: f32[2,128,128], index: 3, kind: input, shape index: {}]   ;;  %s661_s4 = inlined_call_operand.vmem [shape: f32[2,128], index: 4, kind: input, shape index: {}]   ;;  %s662_s5 = inlined_call_operand.hbm [shape: f32[128,128], index: 5, kind: output, shape index: {}]  }
   0x1   :  { %11 = vsyncpa [#allocation4], 0  ;;  %s22_s20 = sshll.u32 %s660_s3, 4  ;;  %s514_s21 = smov [#allocation2]   ;;  %s23_s20 = int_to_ptr.hbm [resolvable:$true] %s22_s20 }
   0x2   :  { %s24_s22 = sshll.u32 %s514_s21, 4  ;;  %s515_s23 = smov 128   ;;  %s25_s22 = int_to_ptr.vmem [resolvable:$true] %s24_s22 }
   0x3   :  { %s516_s24 = smov 8  }
   0x4   :  { %30 = dma.hbm_to_vmem [thread:$0]  %s23_s20, 4096, %s25_s22, [#allocation3], %s515_s23, %s515_s23, %s516_s24  }
   0x5   :  { %510 = dma.done.wait [#allocation3], 4096  }
   0x6   :  { %511 = vsyncadd [#allocation3], 4294963200  ;;  %v54_v0 = vld [vmem:[%s658_s1 + $0x8] sm:$0xff]  ;;  %v53_v1 = vld [vmem:[%s658_s1] sm:$0xff]  ;;  %vm59_vm0 = vcmask 130048   ;;  %s394_s16 = sshll.u32 %s662_s5, 4  ;;  %s395_s16 = int_to_ptr.hbm [resolvable:$true] %s394_s16 }
   0x7   :  { %122 = vmatpush.msra.mxu0 %v54_v0  ;;  %v37_v2 = vld [vmem:[%s657_s0] sm:$0xff]  ;;  %v38_v3 = vld [vmem:[%s657_s0 + $0x8] sm:$0xff]  ;;  %v39_v4 = vld [vmem:[%s657_s0 + $0x10] sm:$0xff] }
   0x8   :  { %v40_v5 = vld [vmem:[%s657_s0 + $0x18] sm:$0xff]  ;;  %v41_v6 = vld [vmem:[%s657_s0 + $0x20] sm:$0xff]  ;;  %v42_v7 = vld [vmem:[%s657_s0 + $0x28] sm:$0xff] }
   0x9   :  { %123 = vmatpush.msra.mxu0 %v53_v1  ;;  %v43_v8 = vld [vmem:[%s657_s0 + $0x30] sm:$0xff]  ;;  %v44_v9 = vld [vmem:[%s657_s0 + $0x38] sm:$0xff]  ;;  %v45_v10 = vld [vmem:[%s657_s0 + $0x40] sm:$0xff] }
   0xa   :  { %407 = vmatmul.msk.f32.vlgmr.msra.gmra.mxu0 %vm59_vm0, %v37_v2  ;;  %v204_v11 = vld [vmem:[#allocation2 + $0x78] sm:$0xff]  ;;  %v203_v12 = vld [vmem:[#allocation2 + $0x70] sm:$0xff]  ;;  %v202_v13 = vld [vmem:[#allocation2 + $0x68] sm:$0xff] }
   0xb   :  { %207 = vmatpush.msra.mxu1 %v204_v11  ;;  %423 = vmatpush.msra.mxu3 %v204_v11  ;;  %v46_v14 = vld [vmem:[%s657_s0 + $0x48] sm:$0xff]  ;;  %v201_v15 = vld [vmem:[#allocation2 + $0x60] sm:$0xff]  ;;  %v200_v16 = vld [vmem:[#allocation2 + $0x58] sm:$0xff] }
   0xc   :  { %v199_v17 = vld [vmem:[#allocation2 + $0x50] sm:$0xff]  ;;  %v198_v18 = vld [vmem:[#allocation2 + $0x48] sm:$0xff]  ;;  %v197_v20 = vld [vmem:[#allocation2 + $0x40] sm:$0xff] }
   0xd   :  { %208 = vmatpush.msra.mxu1 %v203_v12  ;;  %424 = vmatpush.msra.mxu3 %v203_v12  ;;  %v47_v19 = vld [vmem:[%s657_s0 + $0x50] sm:$0xff]  ;;  %v196_v21 = vld [vmem:[#allocation2 + $0x38] sm:$0xff]  ;;  %v194_v23 = vld [vmem:[#allocation2 + $0x28] sm:$0xff] }
   0xe   :  { %v195_v22 = vld [vmem:[#allocation2 + $0x30] sm:$0xff]  ;;  %v48_v24 = vld [vmem:[%s657_s0 + $0x58] sm:$0xff]  ;;  %v193_v25 = vld [vmem:[#allocation2 + $0x20] sm:$0xff] }
   0xf   :  { %209 = vmatpush.msra.mxu1 %v202_v13  ;;  %425 = vmatpush.msra.mxu3 %v202_v13  ;;  %v192_v26 = vld [vmem:[#allocation2 + $0x18] sm:$0xff]  ;;  %v191_v27 = vld [vmem:[#allocation2 + $0x10] sm:$0xff]  ;;  %v49_v28 = vld [vmem:[%s657_s0 + $0x60] sm:$0xff] }
  0x10   :  { %v190_v29 = vld [vmem:[#allocation2 + $0x8] sm:$0xff]  ;;  %v189_v30 = vld [vmem:[#allocation2] sm:$0xff]  ;;  %v51_v32 = vld [vmem:[%s657_s0 + $0x70] sm:$0xff] }
  0x11   :  { %210 = vmatpush.msra.mxu1 %v201_v15  ;;  %426 = vmatpush.msra.mxu3 %v201_v15  ;;  %v50_v31 = vld [vmem:[%s657_s0 + $0x68] sm:$0xff]  ;;  %v52_v33 = vld [vmem:[%s657_s0 + $0x78] sm:$0xff]  ;;  %v627_v34 = vld [vmem:[%s659_s2] ss:$0 sm:$0xff] }
  0x12   :  { %408 = vmatmul.msk.f32.gmra.mxu0 %vm59_vm0, %v38_v3  ;;  %v304_v62 = vld [vmem:[#allocation2 + $0xf8] sm:$0xff]  ;;  %v303_v1 = vld [vmem:[#allocation2 + $0xf0] sm:$0xff]  ;;  %v302_v3 = vld [vmem:[#allocation2 + $0xe8] sm:$0xff] }
  0x13   :  { %211 = vmatpush.msra.mxu1 %v200_v16  ;;  %427 = vmatpush.msra.mxu3 %v200_v16  ;;  %v297_v11 = vld [vmem:[#allocation2 + $0xc0] sm:$0xff]  ;;  %v296_v12 = vld [vmem:[#allocation2 + $0xb8] sm:$0xff]  ;;  %v295_v15 = vld [vmem:[#allocation2 + $0xb0] sm:$0xff] }
  0x14   :  { %307 = vmatpush.msra.mxu2 %v304_v62 }
  0x15   :  { %212 = vmatpush.msra.mxu1 %v199_v17  ;;  %428 = vmatpush.msra.mxu3 %v199_v17  ;;  %v294_v17 = vld [vmem:[#allocation2 + $0xa8] sm:$0xff] }
  0x16   :  { %308 = vmatpush.msra.mxu2 %v303_v1 }
  0x17   :  { %213 = vmatpush.msra.mxu1 %v198_v18  ;;  %429 = vmatpush.msra.mxu3 %v198_v18  ;;  %v293_v18 = vld [vmem:[#allocation2 + $0xa0] sm:$0xff] }
  0x18   :  { %309 = vmatpush.msra.mxu2 %v302_v3 }
  0x19   :  { %214 = vmatpush.msra.mxu1 %v197_v20  ;;  %430 = vmatpush.msra.mxu3 %v197_v20 }
  0x1a   :  { %409 = vmatmul.msk.f32.gmra.mxu0 %vm59_vm0, %v39_v4  ;;  %v301_v4 = vld [vmem:[#allocation2 + $0xe0] sm:$0xff] }
  0x1b   :  { %215 = vmatpush.msra.mxu1 %v196_v21  ;;  %431 = vmatpush.msra.mxu3 %v196_v21 }
  0x1c   :  { %310 = vmatpush.msra.mxu2 %v301_v4 }
  0x1d   :  { %216 = vmatpush.msra.mxu1 %v195_v22  ;;  %432 = vmatpush.msra.mxu3 %v195_v22  ;;  %v291_v22 = vld [vmem:[#allocation2 + $0x90] sm:$0xff] }
  0x1f   :  { %217 = vmatpush.msra.mxu1 %v194_v23  ;;  %433 = vmatpush.msra.mxu3 %v194_v23 }
  0x21   :  { %218 = vmatpush.msra.mxu1 %v193_v25  ;;  %434 = vmatpush.msra.mxu3 %v193_v25  ;;  %v289_v25 = vld [vmem:[#allocation2 + $0x80] sm:$0xff] }
  0x22   :  { %410 = vmatmul.msk.f32.gmra.mxu0 %vm59_vm0, %v40_v5  ;;  %v300_v5 = vld [vmem:[#allocation2 + $0xd8] sm:$0xff] }
  0x23   :  { %219 = vmatpush.msra.mxu1 %v192_v26  ;;  %435 = vmatpush.msra.mxu3 %v192_v26 }
  0x24   :  { %311 = vmatpush.msra.mxu2 %v300_v5 }
  0x25   :  { %220 = vmatpush.msra.mxu1 %v191_v27  ;;  %436 = vmatpush.msra.mxu3 %v191_v27 }
  0x27   :  { %221 = vmatpush.msra.mxu1 %v190_v29  ;;  %437 = vmatpush.msra.mxu3 %v190_v29 }
  0x29   :  { %222 = vmatpush.msra.mxu1 %v189_v30  ;;  %438 = vmatpush.msra.mxu3 %v189_v30 }
  0x2a   :  { %411 = vmatmul.msk.f32.gmra.mxu0 %vm59_vm0, %v41_v6 }
  0x2b   :  { %439 = vmatpush.msrb.mxu3 %v304_v62 }
  0x2d   :  { %440 = vmatpush.msrb.mxu3 %v303_v1 }
  0x2f   :  { %441 = vmatpush.msrb.mxu3 %v302_v3 }
  0x31   :  { %442 = vmatpush.msrb.mxu3 %v301_v4 }
  0x32   :  { %412 = vmatmul.msk.f32.gmra.mxu0 %vm59_vm0, %v42_v7 }
  0x33   :  { %443 = vmatpush.msrb.mxu3 %v300_v5 }
  0x3a   :  { %413 = vmatmul.msk.f32.gmra.mxu0 %vm59_vm0, %v43_v8  ;;  %v299_v8 = vld [vmem:[#allocation2 + $0xd0] sm:$0xff] }
  0x3b   :  { %312 = vmatpush.msra.mxu2 %v299_v8  ;;  %444 = vmatpush.msrb.mxu3 %v299_v8 }
  0x42   :  { %414 = vmatmul.msk.f32.gmra.mxu0 %vm59_vm0, %v44_v9 }
  0x4a   :  { %415 = vmatmul.msk.f32.gmra.mxu0 %vm59_vm0, %v45_v10  ;;  %v298_v10 = vld [vmem:[#allocation2 + $0xc8] sm:$0xff] }
  0x4b   :  { %313 = vmatpush.msra.mxu2 %v298_v10  ;;  %445 = vmatpush.msrb.mxu3 %v298_v10 }
  0x4d   :  { %314 = vmatpush.msra.mxu2 %v297_v11  ;;  %446 = vmatpush.msrb.mxu3 %v297_v11 }
  0x4f   :  { %315 = vmatpush.msra.mxu2 %v296_v12  ;;  %447 = vmatpush.msrb.mxu3 %v296_v12 }
  0x51   :  { %316 = vmatpush.msra.mxu2 %v295_v15  ;;  %448 = vmatpush.msrb.mxu3 %v295_v15 }
  0x52   :  { %416 = vmatmul.msk.f32.gmra.mxu0 %vm59_vm0, %v46_v14 }
  0x53   :  { %317 = vmatpush.msra.mxu2 %v294_v17  ;;  %449 = vmatpush.msrb.mxu3 %v294_v17 }
  0x55   :  { %318 = vmatpush.msra.mxu2 %v293_v18  ;;  %450 = vmatpush.msrb.mxu3 %v293_v18 }
  0x5a   :  { %417 = vmatmul.msk.f32.gmra.mxu0 %vm59_vm0, %v47_v19  ;;  %v292_v19 = vld [vmem:[#allocation2 + $0x98] sm:$0xff] }
  0x5b   :  { %319 = vmatpush.msra.mxu2 %v292_v19  ;;  %451 = vmatpush.msrb.mxu3 %v292_v19 }
  0x5d   :  { %320 = vmatpush.msra.mxu2 %v291_v22  ;;  %452 = vmatpush.msrb.mxu3 %v291_v22 }
  0x62   :  { %418 = vmatmul.msk.f32.gmra.mxu0 %vm59_vm0, %v48_v24  ;;  %v290_v24 = vld [vmem:[#allocation2 + $0x88] sm:$0xff] }
  0x63   :  { %321 = vmatpush.msra.mxu2 %v290_v24  ;;  %453 = vmatpush.msrb.mxu3 %v290_v24 }
  0x65   :  { %322 = vmatpush.msra.mxu2 %v289_v25  ;;  %454 = vmatpush.msrb.mxu3 %v289_v25 }
  0x6a   :  { %419 = vmatmul.msk.f32.gmra.mxu0 %vm59_vm0, %v49_v28 }
  0x72   :  { %420 = vmatmul.msk.f32.gmra.mxu0 %vm59_vm0, %v50_v31 }
  0x7a   :  { %421 = vmatmul.msk.f32.gmra.mxu0 %vm59_vm0, %v51_v32 }
  0x82   :  { %422 = vmatmul.msk.f32.gmra.mxu0 %vm59_vm0, %v52_v33 }
  0x87   :  { %v125_v35 = vpop.f32.mrf.mxu0 }
  0x88   :  { %v126_v36 = vadd.f32 %v627_v34, %v125_v35 }
  0x8a   :  { %v173_v37 = vmax.f32 %v126_v36, 0.0  ;;  %v460_v36 = vld [vmem:[%s661_s4] ss:$0 sm:$0xff] }
  0x8c   :  { %223 = vmatmul.f32.vlgmr.msra.gmra.mxu1 %v173_v37 }
  0x8f   :  { %v128_v38 = vpop.f32.mrf.mxu0 }
  0x90   :  { %v129_v39 = vadd.f32 %v627_v34, %v128_v38 }
  0x92   :  { %v174_v40 = vmax.f32 %v129_v39, 0.0 }
  0x94   :  { %226 = vmatmul.f32.gmra.mxu1 %v174_v40 }
  0x97   :  { %v131_v41 = vpop.f32.mrf.mxu0 }
  0x98   :  { %v132_v42 = vadd.f32 %v627_v34, %v131_v41 }
  0x9a   :  { %v175_v43 = vmax.f32 %v132_v42, 0.0 }
  0x9c   :  { %229 = vmatmul.f32.gmra.mxu1 %v175_v43 }
  0x9f   :  { %v134_v44 = vpop.f32.mrf.mxu0 }
  0xa0   :  { %v135_v45 = vadd.f32 %v627_v34, %v134_v44 }
  0xa2   :  { %v176_v46 = vmax.f32 %v135_v45, 0.0 }
  0xa4   :  { %232 = vmatmul.f32.gmra.mxu1 %v176_v46 }
  0xa7   :  { %v137_v47 = vpop.f32.mrf.mxu0 }
  0xa8   :  { %v138_v48 = vadd.f32 %v627_v34, %v137_v47 }
  0xaa   :  { %v177_v49 = vmax.f32 %v138_v48, 0.0 }
  0xac   :  { %235 = vmatmul.f32.gmra.mxu1 %v177_v49 }
  0xaf   :  { %v140_v50 = vpop.f32.mrf.mxu0 }
  0xb0   :  { %v141_v51 = vadd.f32 %v627_v34, %v140_v50 }
  0xb2   :  { %v178_v52 = vmax.f32 %v141_v51, 0.0 }
  0xb4   :  { %238 = vmatmul.f32.gmra.mxu1 %v178_v52 }
  0xb7   :  { %v143_v53 = vpop.f32.mrf.mxu0 }
  0xb8   :  { %v144_v54 = vadd.f32 %v627_v34, %v143_v53 }
  0xba   :  { %v179_v55 = vmax.f32 %v144_v54, 0.0 }
  0xbc   :  { %241 = vmatmul.f32.gmra.mxu1 %v179_v55 }
  0xbf   :  { %v146_v56 = vpop.f32.mrf.mxu0 }
  0xc0   :  { %v147_v57 = vadd.f32 %v627_v34, %v146_v56 }
  0xc2   :  { %v180_v58 = vmax.f32 %v147_v57, 0.0 }
  0xc4   :  { %244 = vmatmul.f32.gmra.mxu1 %v180_v58 }
  0xc7   :  { %v149_v59 = vpop.f32.mrf.mxu0 }
  0xc8   :  { %v150_v60 = vadd.f32 %v627_v34, %v149_v59 }
  0xca   :  { %v181_v61 = vmax.f32 %v150_v60, 0.0 }
  0xcc   :  { %247 = vmatmul.f32.gmra.mxu1 %v181_v61 }
  0xcf   :  { %v152_v63 = vpop.f32.mrf.mxu0 }
  0xd0   :  { %v153_v0 = vadd.f32 %v627_v34, %v152_v63 }
  0xd2   :  { %v182_v2 = vmax.f32 %v153_v0, 0.0 }
  0xd4   :  { %250 = vmatmul.f32.gmra.mxu1 %v182_v2 }
  0xd7   :  { %v155_v6 = vpop.f32.mrf.mxu0 }
  0xd8   :  { %v156_v7 = vadd.f32 %v627_v34, %v155_v6 }
  0xda   :  { %v183_v9 = vmax.f32 %v156_v7, 0.0 }
  0xdc   :  { %253 = vmatmul.f32.gmra.mxu1 %v183_v9 }
  0xdf   :  { %v158_v13 = vpop.f32.mrf.mxu0 }
  0xe0   :  { %v159_v14 = vadd.f32 %v627_v34, %v158_v13 }
  0xe2   :  { %v184_v16 = vmax.f32 %v159_v14, 0.0 }
  0xe4   :  { %256 = vmatmul.f32.gmra.mxu1 %v184_v16 }
  0xe7   :  { %v161_v20 = vpop.f32.mrf.mxu0 }
  0xe8   :  { %v162_v21 = vadd.f32 %v627_v34, %v161_v20  ;;  %v461_v20 = vld [vmem:[%s661_s4 + $0x1] ss:$0 sm:$0xff]  ;;  %s517_s4 = smov [#allocation5]  }
  0xe9   :  { %s392_s13 = sshll.u32 %s517_s4, 4  ;;  %s393_s13 = int_to_ptr.vmem [resolvable:$true] %s392_s13 }
  0xea   :  { %v185_v23 = vmax.f32 %v162_v21, 0.0 }
  0xec   :  { %259 = vmatmul.f32.vlgmr.msra.gmra.mxu3 %v185_v23 }
  0xef   :  { %v164_v26 = vpop.f32.mrf.mxu0 }
  0xf0   :  { %v165_v27 = vadd.f32 %v627_v34, %v164_v26 }
  0xf2   :  { %v186_v28 = vmax.f32 %v165_v27, 0.0 }
  0xf4   :  { %262 = vmatmul.f32.gmra.mxu3 %v186_v28 }
  0xf7   :  { %v167_v29 = vpop.f32.mrf.mxu0 }
  0xf8   :  { %v168_v30 = vadd.f32 %v627_v34, %v167_v29 }
  0xfa   :  { %v187_v31 = vmax.f32 %v168_v30, 0.0 }
  0xfc   :  { %265 = vmatmul.f32.gmra.mxu3 %v187_v31 }
  0xff   :  { %v170_v32 = vpop.f32.mrf.mxu0 }
 0x100   :  { %v171_v33 = vadd.f32 %v627_v34, %v170_v32 }
 0x102   :  { %v188_v35 = vmax.f32 %v171_v33, 0.0 }
 0x104   :  { %268 = vmatmul.f32.gmra.mxu3 %v188_v35 }
 0x109   :  { %v224_v37 = vpop.f32.mrf.mxu1 }
 0x10a   :  { %v225_v38 = vadd.f32 %v460_v36, %v224_v37 }
 0x10c   :  { %v272_v39 = vmax.f32 %v225_v38, 0.0 }
 0x10e   :  { %323 = vmatmul.f32.vlgmr.msra.gmra.mxu2 %v272_v39 }
 0x111   :  { %v227_v40 = vpop.f32.mrf.mxu1 }
 0x112   :  { %v228_v41 = vadd.f32 %v460_v36, %v227_v40 }
 0x114   :  { %v273_v42 = vmax.f32 %v228_v41, 0.0 }
 0x116   :  { %326 = vmatmul.f32.gmra.mxu2 %v273_v42 }
 0x119   :  { %v230_v43 = vpop.f32.mrf.mxu1 }
 0x11a   :  { %v231_v44 = vadd.f32 %v460_v36, %v230_v43 }
 0x11c   :  { %v274_v45 = vmax.f32 %v231_v44, 0.0 }
 0x11e   :  { %329 = vmatmul.f32.gmra.mxu2 %v274_v45 }
 0x121   :  { %v233_v46 = vpop.f32.mrf.mxu1 }
 0x122   :  { %v234_v34 = vadd.f32 %v460_v36, %v233_v46 }
 0x124   :  { %v275_v47 = vmax.f32 %v234_v34, 0.0 }
 0x126   :  { %332 = vmatmul.f32.gmra.mxu2 %v275_v47 }
 0x129   :  { %v236_v48 = vpop.f32.mrf.mxu1 }
 0x12a   :  { %v237_v49 = vadd.f32 %v460_v36, %v236_v48 }
 0x12c   :  { %v276_v50 = vmax.f32 %v237_v49, 0.0 }
 0x12e   :  { %335 = vmatmul.f32.gmra.mxu2 %v276_v50 }
 0x131   :  { %v239_v51 = vpop.f32.mrf.mxu1 }
 0x132   :  { %v240_v52 = vadd.f32 %v460_v36, %v239_v51 }
 0x134   :  { %v277_v53 = vmax.f32 %v240_v52, 0.0 }
 0x136   :  { %338 = vmatmul.f32.gmra.mxu2 %v277_v53 }
 0x139   :  { %v242_v54 = vpop.f32.mrf.mxu1 }
 0x13a   :  { %v243_v55 = vadd.f32 %v460_v36, %v242_v54 }
 0x13c   :  { %v278_v56 = vmax.f32 %v243_v55, 0.0 }
 0x13e   :  { %341 = vmatmul.f32.gmra.mxu2 %v278_v56 }
 0x141   :  { %v245_v57 = vpop.f32.mrf.mxu1 }
 0x142   :  { %v246_v58 = vadd.f32 %v460_v36, %v245_v57 }
 0x144   :  { %v279_v59 = vmax.f32 %v246_v58, 0.0 }
 0x146   :  { %344 = vmatmul.f32.gmra.mxu2 %v279_v59 }
 0x149   :  { %v248_v60 = vpop.f32.mrf.mxu1 }
 0x14a   :  { %v249_v61 = vadd.f32 %v460_v36, %v248_v60 }
 0x14c   :  { %v280_v62 = vmax.f32 %v249_v61, 0.0 }
 0x14e   :  { %347 = vmatmul.f32.gmra.mxu2 %v280_v62 }
 0x151   :  { %v251_v63 = vpop.f32.mrf.mxu1 }
 0x152   :  { %v252_v0 = vadd.f32 %v460_v36, %v251_v63 }
 0x154   :  { %v281_v1 = vmax.f32 %v252_v0, 0.0 }
 0x156   :  { %350 = vmatmul.f32.gmra.mxu2 %v281_v1 }
 0x159   :  { %v254_v2 = vpop.f32.mrf.mxu1 }
 0x15a   :  { %v255_v3 = vadd.f32 %v460_v36, %v254_v2 }
 0x15c   :  { %v282_v4 = vmax.f32 %v255_v3, 0.0 }
 0x15e   :  { %353 = vmatmul.f32.gmra.mxu2 %v282_v4 }
 0x161   :  { %v257_v5 = vpop.f32.mrf.mxu1 }
 0x162   :  { %v258_v6 = vadd.f32 %v460_v36, %v257_v5 }
 0x164   :  { %v283_v7 = vmax.f32 %v258_v6, 0.0 }
 0x166   :  { %356 = vmatmul.f32.gmra.mxu2 %v283_v7 }
 0x16f   :  { %v260_v8 = vpop.f32.mrf.mxu3 }
 0x170   :  { %v261_v9 = vadd.f32 %v460_v36, %v260_v8 }
 0x172   :  { %v284_v10 = vmax.f32 %v261_v9, 0.0 }
 0x174   :  { %359 = vmatmul.f32.vlgmr.msrb.gmra.mxu3 %v284_v10 }
 0x177   :  { %v263_v11 = vpop.f32.mrf.mxu3 }
 0x178   :  { %v264_v12 = vadd.f32 %v460_v36, %v263_v11 }
 0x17a   :  { %v285_v13 = vmax.f32 %v264_v12, 0.0 }
 0x17c   :  { %362 = vmatmul.f32.gmra.mxu3 %v285_v13 }
 0x17f   :  { %v266_v14 = vpop.f32.mrf.mxu3 }
 0x180   :  { %v267_v15 = vadd.f32 %v460_v36, %v266_v14 }
 0x182   :  { %v286_v16 = vmax.f32 %v267_v15, 0.0 }
 0x184   :  { %365 = vmatmul.f32.gmra.mxu3 %v286_v16 }
 0x187   :  { %v269_v17 = vpop.f32.mrf.mxu3 }
 0x188   :  { %v270_v18 = vadd.f32 %v460_v36, %v269_v17 }
 0x18a   :  { %v287_v19 = vmax.f32 %v270_v18, 0.0 }
 0x18c   :  { %368 = vmatmul.f32.gmra.mxu3 %v287_v19 }
 0x191   :  { %v324_v21 = vpop.f32.mrf.mxu2 }
 0x192   :  { %v325_v22 = vadd.f32 %v461_v20, %v324_v21 }
 0x194   :  { %372 = vst [vmem:[#allocation5] sm:$0xff] %v325_v22 }
 0x199   :  { %v327_v23 = vpop.f32.mrf.mxu2 }
 0x19a   :  { %v328_v24 = vadd.f32 %v461_v20, %v327_v23 }
 0x19c   :  { %373 = vst [vmem:[#allocation5 + $0x8] sm:$0xff] %v328_v24 }
 0x1a1   :  { %v330_v25 = vpop.f32.mrf.mxu2 }
 0x1a2   :  { %v331_v26 = vadd.f32 %v461_v20, %v330_v25 }
 0x1a4   :  { %374 = vst [vmem:[#allocation5 + $0x10] sm:$0xff] %v331_v26 }
 0x1a9   :  { %v333_v27 = vpop.f32.mrf.mxu2 }
 0x1aa   :  { %v334_v28 = vadd.f32 %v461_v20, %v333_v27 }
 0x1ac   :  { %375 = vst [vmem:[#allocation5 + $0x18] sm:$0xff] %v334_v28 }
 0x1b1   :  { %v336_v29 = vpop.f32.mrf.mxu2 }
 0x1b2   :  { %v337_v30 = vadd.f32 %v461_v20, %v336_v29 }
 0x1b4   :  { %376 = vst [vmem:[#allocation5 + $0x20] sm:$0xff] %v337_v30 }
 0x1b9   :  { %v339_v31 = vpop.f32.mrf.mxu2 }
 0x1ba   :  { %v340_v32 = vadd.f32 %v461_v20, %v339_v31 }
 0x1bc   :  { %377 = vst [vmem:[#allocation5 + $0x28] sm:$0xff] %v340_v32 }
 0x1c1   :  { %v342_v33 = vpop.f32.mrf.mxu2 }
 0x1c2   :  { %v343_v35 = vadd.f32 %v461_v20, %v342_v33 }
 0x1c4   :  { %378 = vst [vmem:[#allocation5 + $0x30] sm:$0xff] %v343_v35 }
 0x1c9   :  { %v345_v36 = vpop.f32.mrf.mxu2 }
 0x1ca   :  { %v346_v37 = vadd.f32 %v461_v20, %v345_v36 }
 0x1cc   :  { %379 = vst [vmem:[#allocation5 + $0x38] sm:$0xff] %v346_v37 }
 0x1d1   :  { %v348_v38 = vpop.f32.mrf.mxu2 }
 0x1d2   :  { %v349_v39 = vadd.f32 %v461_v20, %v348_v38 }
 0x1d4   :  { %380 = vst [vmem:[#allocation5 + $0x40] sm:$0xff] %v349_v39 }
 0x1d9   :  { %v351_v40 = vpop.f32.mrf.mxu2 }
 0x1da   :  { %v352_v41 = vadd.f32 %v461_v20, %v351_v40 }
 0x1dc   :  { %381 = vst [vmem:[#allocation5 + $0x48] sm:$0xff] %v352_v41 }
 0x1e1   :  { %v354_v42 = vpop.f32.mrf.mxu2 }
 0x1e2   :  { %v355_v43 = vadd.f32 %v461_v20, %v354_v42 }
 0x1e4   :  { %382 = vst [vmem:[#allocation5 + $0x50] sm:$0xff] %v355_v43 }
 0x1e9   :  { %v357_v44 = vpop.f32.mrf.mxu2 }
 0x1ea   :  { %v358_v45 = vadd.f32 %v461_v20, %v357_v44 }
 0x1ec   :  { %383 = vst [vmem:[#allocation5 + $0x58] sm:$0xff] %v358_v45 }
 0x1f7   :  { %v360_v46 = vpop.f32.mrf.mxu3 }
 0x1f8   :  { %v361_v34 = vadd.f32 %v461_v20, %v360_v46 }
 0x1fa   :  { %384 = vst [vmem:[#allocation5 + $0x60] sm:$0xff] %v361_v34 }
 0x1ff   :  { %v363_v47 = vpop.f32.mrf.mxu3 }
 0x200   :  { %v364_v48 = vadd.f32 %v461_v20, %v363_v47 }
 0x202   :  { %385 = vst [vmem:[#allocation5 + $0x68] sm:$0xff] %v364_v48 }
 0x207   :  { %v366_v49 = vpop.f32.mrf.mxu3 }
 0x208   :  { %v367_v50 = vadd.f32 %v461_v20, %v366_v49 }
 0x20a   :  { %386 = vst [vmem:[#allocation5 + $0x70] sm:$0xff] %v367_v50 }
 0x20f   :  { %v369_v51 = vpop.f32.mrf.mxu3 }
 0x210   :  { %v370_v52 = vadd.f32 %v461_v20, %v369_v51 }
 0x212   :  { %387 = vst [vmem:[#allocation5 + $0x78] sm:$0xff] %v370_v52 }
 0x213   :  { %400 = dma.vmem_to_hbm [thread:$0]  %s393_s13, 2048, %s395_s16, [#allocation4], %s515_s23, %s515_s23, %s516_s24  }
 0x214   :  { %512 = dma.done.wait [#allocation4], 2048  }
 0x215   :  { %513 = vsyncadd [#allocation4], 4294965248 }
 0x216   :  { %405 = vsyncpa [#allocation3], 1 }
 0x217   :  { %406 = vsyncpa [#allocation4], 1 }

</bundles_post_ra>
